<compile_context>
chip_gen: v7x
topology: tpu7x:2x2x1
jax: 0.10.0
libtpu: 0.0.40
codegen_flags: <defaults>
</compile_context>

<pallas_src>
import functools
import math

import jax
import jax.numpy as jnp
from jax.experimental import pallas as pl
from jax.experimental.pallas import tpu as pltpu


def _vae_kernel(
    # batch-tiled inputs
    x_ref, eps_ref,
    # weight matrices (bf16, resident in VMEM)
    ew1_ref, ew2_ref, ew3_ref, ehw_ref,
    dw1_ref, dw2_ref, dw3_ref, dw4_ref,
    # packed bias slab (f32, resident in VMEM): row r = bias r, zero-padded
    bias_ref,
    # outputs
    xhat_ref, z_ref,
):
    f32 = jnp.float32
    bf16 = jnp.bfloat16
    sigmoid = jax.nn.sigmoid              # activation='sigmoid' (module default)
    latent = eps_ref.shape[1]

    def linear(v_bf16, w_ref, bias_row):
        n = w_ref.shape[1]
        acc = jnp.dot(v_bf16, w_ref[...], preferred_element_type=f32)
        return acc + bias_ref[bias_row:bias_row + 1, :n]        # f32 bias add

    x = x_ref[...]                                              # bf16 (TB, D)

    # ---------------- Encoder ----------------
    h = sigmoid(linear(x, ew1_ref, 0))                          # (TB, hidden)
    h = sigmoid(linear(h.astype(bf16), ew2_ref, 1))             # (TB, hidden)
    h = sigmoid(linear(h.astype(bf16), ew3_ref, 2))             # (TB, hidden//2)

    head = linear(h.astype(bf16), ehw_ref, 3)                   # (TB, 2*latent) f32
    mu = head[:, :latent]
    log_var = head[:, latent:2 * latent]

    # reparameterization exactly as in the reference module:
    # sigma = 0.5 * exp(log_variance); z = mu + sigma * eps, eps ~ N(0, 1)
    z = mu + 0.5 * jnp.exp(log_var) * eps_ref[...]              # (TB, latent) f32

    # ---------------- Decoder ----------------
    d = sigmoid(linear(z.astype(bf16), dw1_ref, 4))             # (TB, hidden//2)
    d = sigmoid(linear(d.astype(bf16), dw2_ref, 5))             # (TB, hidden)
    d = sigmoid(linear(d.astype(bf16), dw3_ref, 6))             # (TB, hidden)
    xhat_ref[...] = jnp.maximum(linear(d.astype(bf16), dw4_ref, 7), 0.0)  # ReLU
    z_ref[...] = z


@functools.partial(jax.jit, static_argnames=("tb",))
def vae_forward(x, eps, params, tb=512):
    """Batched VAE forward.

    x:   (B, ...)          each sample is flattened to input_dim (per-sample
                           equivalent of the PyTorch module's x.flatten()).
    eps: (B, latent_dim)   standard-normal noise sampled outside the kernel.
    Returns (x_hat, z) with shapes (B, input_dim), (B, latent_dim) in f32.
    """
    batch = x.shape[0]
    input_dim = math.prod(x.shape[1:])
    latent_dim = eps.shape[1]

    # bf16 MXU operands; eps / biases / outputs stay f32.
    x2 = x.reshape(batch, input_dim).astype(jnp.bfloat16)
    eps2 = eps.astype(jnp.float32)

    # Fuse the mu / log_var heads into one matmul (concat done once, here).
    head_w = jnp.concatenate([params["ewmu"], params["ewlv"]], axis=1)
    head_b = jnp.concatenate([params["ebmu"], params["eblv"]], axis=1)

    weights = [
        params["ew1"], params["ew2"], params["ew3"], head_w,
        params["dw1"], params["dw2"], params["dw3"], params["dw4"],
    ]
    weights_bf16 = [w.astype(jnp.bfloat16) for w in weights]

    biases = [
        params["eb1"], params["eb2"], params["eb3"], head_b,
        params["db1"], params["db2"], params["db3"], params["db4"],
    ]
    bmax = max(b.shape[1] for b in biases)
    bias_slab = jnp.concatenate(
        [jnp.pad(b.astype(jnp.float32), ((0, 0), (0, bmax - b.shape[1])))
         for b in biases],
        axis=0)                                           # (8, bmax) f32

    # Batch tile: scale with batch so small tests don't over-pad while large
    # batches get multiple pipelined grid steps per TensorCore.
    tb_eff = min(tb, ((batch + 7) // 8) * 8)
    nb = pl.cdiv(batch, tb_eff)
    bp = nb * tb_eff
    if bp != batch:
        x2 = jnp.pad(x2, ((0, bp - batch), (0, 0)))
        eps2 = jnp.pad(eps2, ((0, bp - batch), (0, 0)))

    def batch_spec(cols):
        return pl.BlockSpec((tb_eff, cols), lambda b: (b, 0))

    def resident_spec(arr):
        # Full-array block with a constant index_map: DMA'd once, stays in
        # VMEM across all batch-grid steps.
        return pl.BlockSpec(arr.shape, lambda b: (0, 0))

    x_hat, z = pl.pallas_call(
        _vae_kernel,
        grid=(nb,),
        in_specs=[batch_spec(input_dim), batch_spec(latent_dim)]
                 + [resident_spec(w) for w in weights_bf16]
                 + [resident_spec(bias_slab)],
        out_specs=(batch_spec(input_dim), batch_spec(latent_dim)),
        out_shape=(
            jax.ShapeDtypeStruct((bp, input_dim), jnp.float32),
            jax.ShapeDtypeStruct((bp, latent_dim), jnp.float32),
        ),
        compiler_params=pltpu.CompilerParams(
            dimension_semantics=("parallel",)),
    )(x2, eps2, *weights_bf16, bias_slab)

    return x_hat[:batch], z[:batch]


def init_params(key, input_dim, hidden_dim, latent_dim):
    """Deterministic synthetic init.  Weights stored as (in, out), biases (1, out)."""
    h2 = hidden_dim // 2
    shapes = {
        # encoder
        "ew1": (input_dim, hidden_dim), "eb1": (1, hidden_dim),
        "ew2": (hidden_dim, hidden_dim), "eb2": (1, hidden_dim),
        "ew3": (hidden_dim, h2),         "eb3": (1, h2),
        "ewmu": (h2, latent_dim),        "ebmu": (1, latent_dim),
        "ewlv": (h2, latent_dim),        "eblv": (1, latent_dim),
        # decoder
        "dw1": (latent_dim, h2),         "db1": (1, h2),
        "dw2": (h2, hidden_dim),         "db2": (1, hidden_dim),
        "dw3": (hidden_dim, hidden_dim), "db3": (1, hidden_dim),
        "dw4": (hidden_dim, input_dim),  "db4": (1, input_dim),
    }
    params = {}
    keys = jax.random.split(key, len(shapes))
    for k, (name, shape) in zip(keys, sorted(shapes.items())):
        fan_in = shape[0] if len(shape) == 2 and shape[0] > 1 else max(shape)
        scale = 1.0 / jnp.sqrt(jnp.float32(fan_in))
        params[name] = jax.random.uniform(k, shape, jnp.float32, -1.0, 1.0) * scale
    return params


def _reference_forward(x, eps, params):
    """Plain-JAX f32 reference mirroring the PyTorch module (applied per row)."""
    sig = jax.nn.sigmoid
    batch = x.shape[0]
    xf = x.reshape(batch, -1)
    h = sig(xf @ params["ew1"] + params["eb1"])
    h = sig(h @ params["ew2"] + params["eb2"])
    h = sig(h @ params["ew3"] + params["eb3"])
    mu = h @ params["ewmu"] + params["ebmu"]
    lv = h @ params["ewlv"] + params["eblv"]
    z = mu + 0.5 * jnp.exp(lv) * eps            # sigma = 0.5*exp(log_var), as in module
    d = sig(z @ params["dw1"] + params["db1"])
    d = sig(d @ params["dw2"] + params["db2"])
    d = sig(d @ params["dw3"] + params["db3"])
    x_hat = jnp.maximum(d @ params["dw4"] + params["db4"], 0.0)
    return x_hat, z


if __name__ == "__main__":
    # Each sample has shape (4, 8, 8) -> flattened input_dim = 256, matching
    # the module's per-sample x.flatten().  Small batch for the smoke test;
    # tb_eff auto-shrinks so we don't pad 4 rows up to 512.
    C, H, W = 4, 8, 8
    input_dim = C * H * W          # 256
    hidden_dim = 64
    latent_dim = 16
    batch = 4

    key = jax.random.PRNGKey(0)
    k_x, k_eps, k_p = jax.random.split(key, 3)

    x = jax.random.normal(k_x, (batch, C, H, W), jnp.float32)
    # eps ~ N(0,1) sampled outside the kernel (deterministic stand-in for
    # torch.distributions.Normal(0,1).sample(mu.shape))
    eps = jax.random.normal(k_eps, (batch, latent_dim), jnp.float32)

    params = init_params(k_p, input_dim, hidden_dim, latent_dim)

    x_hat, z = vae_forward(x, eps, params)
    jax.block_until_ready((x_hat, z))

    # sanity check against plain-JAX f32 reference (bf16 matmuls -> loose tol)
    x_hat_ref, z_ref = _reference_forward(x, eps, params)
    assert x_hat.shape == (batch, input_dim) and z.shape == (batch, latent_dim)
    assert jnp.allclose(x_hat, x_hat_ref, atol=3e-2, rtol=3e-2)
    assert jnp.allclose(z, z_ref, atol=3e-2, rtol=3e-2)

    print("KERNEL_OK")
</pallas_src>

<mosaic_0001>
module attributes {stable_mosaic.version = 11 : i64} {
  func.func @_vae_kernel(%arg0: i32, %arg1: memref<8x256xbf16, #tpu.memory_space<vmem>>, %arg2: memref<8x16xf32, #tpu.memory_space<vmem>>, %arg3: memref<256x64xbf16, #tpu.memory_space<vmem>>, %arg4: memref<64x64xbf16, #tpu.memory_space<vmem>>, %arg5: memref<64x32xbf16, #tpu.memory_space<vmem>>, %arg6: memref<32x32xbf16, #tpu.memory_space<vmem>>, %arg7: memref<16x32xbf16, #tpu.memory_space<vmem>>, %arg8: memref<32x64xbf16, #tpu.memory_space<vmem>>, %arg9: memref<64x64xbf16, #tpu.memory_space<vmem>>, %arg10: memref<64x256xbf16, #tpu.memory_space<vmem>>, %arg11: memref<8x256xf32, #tpu.memory_space<vmem>>, %arg12: memref<8x256xf32, #tpu.memory_space<vmem>>, %arg13: memref<8x16xf32, #tpu.memory_space<vmem>>) attributes {dimension_semantics = [#tpu.dimension_semantics<parallel>], iteration_bounds = array<i64: 1>, scalar_prefetch = 0 : i64, scratch_operands = 0 : i64, tpu.core_type = #tpu.core_type<tc>, window_params = [{transform_indices = @transform_0, window_bounds = array<i64: 8, 256>}, {transform_indices = @transform_1, window_bounds = array<i64: 8, 16>}, {pipeline_mode = #tpu.pipeline_mode<synchronous>, transform_indices = @transform_2, window_bounds = array<i64: 256, 64>}, {pipeline_mode = #tpu.pipeline_mode<synchronous>, transform_indices = @transform_3, window_bounds = array<i64: 64, 64>}, {pipeline_mode = #tpu.pipeline_mode<synchronous>, transform_indices = @transform_4, window_bounds = array<i64: 64, 32>}, {pipeline_mode = #tpu.pipeline_mode<synchronous>, transform_indices = @transform_5, window_bounds = array<i64: 32, 32>}, {pipeline_mode = #tpu.pipeline_mode<synchronous>, transform_indices = @transform_6, window_bounds = array<i64: 16, 32>}, {pipeline_mode = #tpu.pipeline_mode<synchronous>, transform_indices = @transform_7, window_bounds = array<i64: 32, 64>}, {pipeline_mode = #tpu.pipeline_mode<synchronous>, transform_indices = @transform_8, window_bounds = array<i64: 64, 64>}, {pipeline_mode = #tpu.pipeline_mode<synchronous>, transform_indices = @transform_9, window_bounds = array<i64: 64, 256>}, {pipeline_mode = #tpu.pipeline_mode<synchronous>, transform_indices = @transform_10, window_bounds = array<i64: 8, 256>}, {transform_indices = @transform_11, window_bounds = array<i64: 8, 256>}, {transform_indices = @transform_12, window_bounds = array<i64: 8, 16>}]} {
    %c0 = arith.constant 0 : index
    %c0_0 = arith.constant 0 : index
    %0 = vector.load %arg1[%c0, %c0_0] : memref<8x256xbf16, #tpu.memory_space<vmem>>, vector<8x256xbf16>
    %c0_1 = arith.constant 0 : index
    %c0_2 = arith.constant 0 : index
    %1 = vector.load %arg3[%c0_1, %c0_2] : memref<256x64xbf16, #tpu.memory_space<vmem>>, vector<256x64xbf16>
    %cst = arith.constant dense<0.000000e+00> : vector<8x64xf32>
    %2 = tpu.matmul %0, %1, %cst {dimension_numbers = #tpu.dot_dimension_numbers<[1], [0], [0], [1], [0, 0, 1, 1], [], []>} : vector<8x256xbf16>, vector<256x64xbf16>, vector<8x64xf32> -> vector<8x64xf32>
    %c0_3 = arith.constant 0 : index
    %c0_4 = arith.constant 0 : index
    %3 = vector.load %arg11[%c0_3, %c0_4] : memref<8x256xf32, #tpu.memory_space<vmem>>, vector<1x64xf32>
    %4 = vector.broadcast %3 : vector<1x64xf32> to vector<8x64xf32>
    %5 = arith.addf %2, %4 : vector<8x64xf32>
    %6 = arith.negf %5 : vector<8x64xf32>
    %7 = math.exp %6 : vector<8x64xf32>
    %cst_5 = arith.constant 1.000000e+00 : f32
    %8 = vector.broadcast %cst_5 : f32 to vector<8x64xf32>
    %9 = arith.addf %8, %7 : vector<8x64xf32>
    %10 = arith.divf %8, %9 : vector<8x64xf32>
    %11 = arith.truncf %10 : vector<8x64xf32> to vector<8x64xbf16>
    %c0_6 = arith.constant 0 : index
    %c0_7 = arith.constant 0 : index
    %12 = vector.load %arg4[%c0_6, %c0_7] : memref<64x64xbf16, #tpu.memory_space<vmem>>, vector<64x64xbf16>
    %cst_8 = arith.constant dense<0.000000e+00> : vector<8x64xf32>
    %13 = tpu.matmul %11, %12, %cst_8 {dimension_numbers = #tpu.dot_dimension_numbers<[1], [0], [0], [1], [0, 0, 1, 1], [], []>} : vector<8x64xbf16>, vector<64x64xbf16>, vector<8x64xf32> -> vector<8x64xf32>
    %c1 = arith.constant 1 : index
    %c0_9 = arith.constant 0 : index
    %14 = vector.load %arg11[%c1, %c0_9] : memref<8x256xf32, #tpu.memory_space<vmem>>, vector<1x64xf32>
    %15 = vector.broadcast %14 : vector<1x64xf32> to vector<8x64xf32>
    %16 = arith.addf %13, %15 : vector<8x64xf32>
    %17 = arith.negf %16 : vector<8x64xf32>
    %18 = math.exp %17 : vector<8x64xf32>
    %cst_10 = arith.constant 1.000000e+00 : f32
    %19 = vector.broadcast %cst_10 : f32 to vector<8x64xf32>
    %20 = arith.addf %19, %18 : vector<8x64xf32>
    %21 = arith.divf %19, %20 : vector<8x64xf32>
    %22 = arith.truncf %21 : vector<8x64xf32> to vector<8x64xbf16>
    %c0_11 = arith.constant 0 : index
    %c0_12 = arith.constant 0 : index
    %23 = vector.load %arg5[%c0_11, %c0_12] : memref<64x32xbf16, #tpu.memory_space<vmem>>, vector<64x32xbf16>
    %cst_13 = arith.constant dense<0.000000e+00> : vector<8x32xf32>
    %24 = tpu.matmul %22, %23, %cst_13 {dimension_numbers = #tpu.dot_dimension_numbers<[1], [0], [0], [1], [0, 0, 1, 1], [], []>} : vector<8x64xbf16>, vector<64x32xbf16>, vector<8x32xf32> -> vector<8x32xf32>
    %c2 = arith.constant 2 : index
    %c0_14 = arith.constant 0 : index
    %25 = vector.load %arg11[%c2, %c0_14] : memref<8x256xf32, #tpu.memory_space<vmem>>, vector<1x32xf32>
    %26 = vector.broadcast %25 : vector<1x32xf32> to vector<8x32xf32>
    %27 = arith.addf %24, %26 : vector<8x32xf32>
    %28 = arith.negf %27 : vector<8x32xf32>
    %29 = math.exp %28 : vector<8x32xf32>
    %cst_15 = arith.constant 1.000000e+00 : f32
    %30 = vector.broadcast %cst_15 : f32 to vector<8x32xf32>
    %31 = arith.addf %30, %29 : vector<8x32xf32>
    %32 = arith.divf %30, %31 : vector<8x32xf32>
    %33 = arith.truncf %32 : vector<8x32xf32> to vector<8x32xbf16>
    %c0_16 = arith.constant 0 : index
    %c0_17 = arith.constant 0 : index
    %34 = vector.load %arg6[%c0_16, %c0_17] : memref<32x32xbf16, #tpu.memory_space<vmem>>, vector<32x32xbf16>
    %cst_18 = arith.constant dense<0.000000e+00> : vector<8x32xf32>
    %35 = tpu.matmul %33, %34, %cst_18 {dimension_numbers = #tpu.dot_dimension_numbers<[1], [0], [0], [1], [0, 0, 1, 1], [], []>} : vector<8x32xbf16>, vector<32x32xbf16>, vector<8x32xf32> -> vector<8x32xf32>
    %c3 = arith.constant 3 : index
    %c0_19 = arith.constant 0 : index
    %36 = vector.load %arg11[%c3, %c0_19] : memref<8x256xf32, #tpu.memory_space<vmem>>, vector<1x32xf32>
    %37 = vector.broadcast %36 : vector<1x32xf32> to vector<8x32xf32>
    %38 = arith.addf %35, %37 : vector<8x32xf32>
    %39 = vector.extract_strided_slice %38 {offsets = [0, 0], sizes = [8, 16], strides = [1, 1]} : vector<8x32xf32> to vector<8x16xf32>
    %40 = vector.extract_strided_slice %38 {offsets = [0, 16], sizes = [8, 16], strides = [1, 1]} : vector<8x32xf32> to vector<8x16xf32>
    %41 = math.exp %40 : vector<8x16xf32>
    %cst_20 = arith.constant 5.000000e-01 : f32
    %42 = vector.broadcast %cst_20 : f32 to vector<8x16xf32>
    %43 = arith.mulf %42, %41 : vector<8x16xf32>
    %c0_21 = arith.constant 0 : index
    %c0_22 = arith.constant 0 : index
    %44 = vector.load %arg2[%c0_21, %c0_22] : memref<8x16xf32, #tpu.memory_space<vmem>>, vector<8x16xf32>
    %45 = arith.mulf %43, %44 : vector<8x16xf32>
    %46 = arith.addf %39, %45 : vector<8x16xf32>
    %47 = arith.truncf %46 : vector<8x16xf32> to vector<8x16xbf16>
    %c0_23 = arith.constant 0 : index
    %c0_24 = arith.constant 0 : index
    %48 = vector.load %arg7[%c0_23, %c0_24] : memref<16x32xbf16, #tpu.memory_space<vmem>>, vector<16x32xbf16>
    %cst_25 = arith.constant dense<0.000000e+00> : vector<8x32xf32>
    %49 = tpu.matmul %47, %48, %cst_25 {dimension_numbers = #tpu.dot_dimension_numbers<[1], [0], [0], [1], [0, 0, 1, 1], [], []>} : vector<8x16xbf16>, vector<16x32xbf16>, vector<8x32xf32> -> vector<8x32xf32>
    %c4 = arith.constant 4 : index
    %c0_26 = arith.constant 0 : index
    %50 = vector.load %arg11[%c4, %c0_26] : memref<8x256xf32, #tpu.memory_space<vmem>>, vector<1x32xf32>
    %51 = vector.broadcast %50 : vector<1x32xf32> to vector<8x32xf32>
    %52 = arith.addf %49, %51 : vector<8x32xf32>
    %53 = arith.negf %52 : vector<8x32xf32>
    %54 = math.exp %53 : vector<8x32xf32>
    %cst_27 = arith.constant 1.000000e+00 : f32
    %55 = vector.broadcast %cst_27 : f32 to vector<8x32xf32>
    %56 = arith.addf %55, %54 : vector<8x32xf32>
    %57 = arith.divf %55, %56 : vector<8x32xf32>
    %58 = arith.truncf %57 : vector<8x32xf32> to vector<8x32xbf16>
    %c0_28 = arith.constant 0 : index
    %c0_29 = arith.constant 0 : index
    %59 = vector.load %arg8[%c0_28, %c0_29] : memref<32x64xbf16, #tpu.memory_space<vmem>>, vector<32x64xbf16>
    %cst_30 = arith.constant dense<0.000000e+00> : vector<8x64xf32>
    %60 = tpu.matmul %58, %59, %cst_30 {dimension_numbers = #tpu.dot_dimension_numbers<[1], [0], [0], [1], [0, 0, 1, 1], [], []>} : vector<8x32xbf16>, vector<32x64xbf16>, vector<8x64xf32> -> vector<8x64xf32>
    %c5 = arith.constant 5 : index
    %c0_31 = arith.constant 0 : index
    %61 = vector.load %arg11[%c5, %c0_31] : memref<8x256xf32, #tpu.memory_space<vmem>>, vector<1x64xf32>
    %62 = vector.broadcast %61 : vector<1x64xf32> to vector<8x64xf32>
    %63 = arith.addf %60, %62 : vector<8x64xf32>
    %64 = arith.negf %63 : vector<8x64xf32>
    %65 = math.exp %64 : vector<8x64xf32>
    %cst_32 = arith.constant 1.000000e+00 : f32
    %66 = vector.broadcast %cst_32 : f32 to vector<8x64xf32>
    %67 = arith.addf %66, %65 : vector<8x64xf32>
    %68 = arith.divf %66, %67 : vector<8x64xf32>
    %69 = arith.truncf %68 : vector<8x64xf32> to vector<8x64xbf16>
    %c0_33 = arith.constant 0 : index
    %c0_34 = arith.constant 0 : index
    %70 = vector.load %arg9[%c0_33, %c0_34] : memref<64x64xbf16, #tpu.memory_space<vmem>>, vector<64x64xbf16>
    %cst_35 = arith.constant dense<0.000000e+00> : vector<8x64xf32>
    %71 = tpu.matmul %69, %70, %cst_35 {dimension_numbers = #tpu.dot_dimension_numbers<[1], [0], [0], [1], [0, 0, 1, 1], [], []>} : vector<8x64xbf16>, vector<64x64xbf16>, vector<8x64xf32> -> vector<8x64xf32>
    %c6 = arith.constant 6 : index
    %c0_36 = arith.constant 0 : index
    %72 = vector.load %arg11[%c6, %c0_36] : memref<8x256xf32, #tpu.memory_space<vmem>>, vector<1x64xf32>
    %73 = vector.broadcast %72 : vector<1x64xf32> to vector<8x64xf32>
    %74 = arith.addf %71, %73 : vector<8x64xf32>
    %75 = arith.negf %74 : vector<8x64xf32>
    %76 = math.exp %75 : vector<8x64xf32>
    %cst_37 = arith.constant 1.000000e+00 : f32
    %77 = vector.broadcast %cst_37 : f32 to vector<8x64xf32>
    %78 = arith.addf %77, %76 : vector<8x64xf32>
    %79 = arith.divf %77, %78 : vector<8x64xf32>
    %80 = arith.truncf %79 : vector<8x64xf32> to vector<8x64xbf16>
    %c0_38 = arith.constant 0 : index
    %c0_39 = arith.constant 0 : index
    %81 = vector.load %arg10[%c0_38, %c0_39] : memref<64x256xbf16, #tpu.memory_space<vmem>>, vector<64x256xbf16>
    %cst_40 = arith.constant dense<0.000000e+00> : vector<8x256xf32>
    %82 = tpu.matmul %80, %81, %cst_40 {dimension_numbers = #tpu.dot_dimension_numbers<[1], [0], [0], [1], [0, 0, 1, 1], [], []>} : vector<8x64xbf16>, vector<64x256xbf16>, vector<8x256xf32> -> vector<8x256xf32>
    %c7 = arith.constant 7 : index
    %c0_41 = arith.constant 0 : index
    %83 = vector.load %arg11[%c7, %c0_41] : memref<8x256xf32, #tpu.memory_space<vmem>>, vector<1x256xf32>
    %84 = vector.broadcast %83 : vector<1x256xf32> to vector<8x256xf32>
    %85 = arith.addf %82, %84 : vector<8x256xf32>
    %cst_42 = arith.constant 0.000000e+00 : f32
    %86 = vector.broadcast %cst_42 : f32 to vector<8x256xf32>
    %87 = arith.maximumf %85, %86 : vector<8x256xf32>
    %c0_43 = arith.constant 0 : index
    %c0_44 = arith.constant 0 : index
    %88 = vector.load %arg12[%c0_43, %c0_44] : memref<8x256xf32, #tpu.memory_space<vmem>>, vector<8x256xf32>
    tpu.vector_store %arg12[%c0_43, %c0_44], %87 {strides = array<i32>} : memref<8x256xf32, #tpu.memory_space<vmem>>, vector<8x256xf32>,
    %c0_45 = arith.constant 0 : index
    %c0_46 = arith.constant 0 : index
    %89 = vector.load %arg13[%c0_45, %c0_46] : memref<8x16xf32, #tpu.memory_space<vmem>>, vector<8x16xf32>
    tpu.vector_store %arg13[%c0_45, %c0_46], %46 {strides = array<i32>} : memref<8x16xf32, #tpu.memory_space<vmem>>, vector<8x16xf32>,
    return
  }
  func.func @transform_0(%arg0: i32) -> (i32, i32) {
    %c0_i32 = arith.constant 0 : i32
    %c0_i32_0 = arith.constant 0 : i32
    return %arg0, %c0_i32 : i32, i32
  }
  func.func @transform_1(%arg0: i32) -> (i32, i32) {
    %c0_i32 = arith.constant 0 : i32
    %c0_i32_0 = arith.constant 0 : i32
    return %arg0, %c0_i32 : i32, i32
  }
  func.func @transform_2(%arg0: i32) -> (i32, i32) {
    %c0_i32 = arith.constant 0 : i32
    %c0_i32_0 = arith.constant 0 : i32
    %c0_i32_1 = arith.constant 0 : i32
    return %c0_i32, %c0_i32_0 : i32, i32
  }
  func.func @transform_3(%arg0: i32) -> (i32, i32) {
    %c0_i32 = arith.constant 0 : i32
    %c0_i32_0 = arith.constant 0 : i32
    %c0_i32_1 = arith.constant 0 : i32
    return %c0_i32, %c0_i32_0 : i32, i32
  }
  func.func @transform_4(%arg0: i32) -> (i32, i32) {
    %c0_i32 = arith.constant 0 : i32
    %c0_i32_0 = arith.constant 0 : i32
    %c0_i32_1 = arith.constant 0 : i32
    return %c0_i32, %c0_i32_0 : i32, i32
  }
  func.func @transform_5(%arg0: i32) -> (i32, i32) {
    %c0_i32 = arith.constant 0 : i32
    %c0_i32_0 = arith.constant 0 : i32
    %c0_i32_1 = arith.constant 0 : i32
    return %c0_i32, %c0_i32_0 : i32, i32
  }
  func.func @transform_6(%arg0: i32) -> (i32, i32) {
    %c0_i32 = arith.constant 0 : i32
    %c0_i32_0 = arith.constant 0 : i32
    %c0_i32_1 = arith.constant 0 : i32
    return %c0_i32, %c0_i32_0 : i32, i32
  }
  func.func @transform_7(%arg0: i32) -> (i32, i32) {
    %c0_i32 = arith.constant 0 : i32
    %c0_i32_0 = arith.constant 0 : i32
    %c0_i32_1 = arith.constant 0 : i32
    return %c0_i32, %c0_i32_0 : i32, i32
  }
  func.func @transform_8(%arg0: i32) -> (i32, i32) {
    %c0_i32 = arith.constant 0 : i32
    %c0_i32_0 = arith.constant 0 : i32
    %c0_i32_1 = arith.constant 0 : i32
    return %c0_i32, %c0_i32_0 : i32, i32
  }
  func.func @transform_9(%arg0: i32) -> (i32, i32) {
    %c0_i32 = arith.constant 0 : i32
    %c0_i32_0 = arith.constant 0 : i32
    %c0_i32_1 = arith.constant 0 : i32
    return %c0_i32, %c0_i32_0 : i32, i32
  }
  func.func @transform_10(%arg0: i32) -> (i32, i32) {
    %c0_i32 = arith.constant 0 : i32
    %c0_i32_0 = arith.constant 0 : i32
    %c0_i32_1 = arith.constant 0 : i32
    return %c0_i32, %c0_i32_0 : i32, i32
  }
  func.func @transform_11(%arg0: i32) -> (i32, i32) {
    %c0_i32 = arith.constant 0 : i32
    %c0_i32_0 = arith.constant 0 : i32
    return %arg0, %c0_i32 : i32, i32
  }
  func.func @transform_12(%arg0: i32) -> (i32, i32) {
    %c0_i32 = arith.constant 0 : i32
    %c0_i32_0 = arith.constant 0 : i32
    return %arg0, %c0_i32 : i32, i32
  }
}

</mosaic_0001>

<bundles_post_ra>
// kernel: vae_forward.1
= control target key start
LH: loop header
LB: loop body
LE: loop exit
PB: predicated region body
PF: predicated region fallthrough
CT: control target
= control target key end

     0   :  { %v1034_v20 = vmov 0.0   ;;  %vm1035_vm0 = vmmov 0   ;;  %vm258_vm1 = vcmask 523264   ;;  %vm409_vm2 = vcmask 261120   ;;  %s1037_s26 = smov 112   ;;  %s1301_s2 = inlined_call_operand.vmem [shape: bf16[256,64], index: 2, kind: input, shape index: {}]   ;;  %s1302_s0 = inlined_call_operand.vmem [shape: bf16[8,256], index: 0, kind: input, shape index: {}]   ;;  %s1303_s3 = inlined_call_operand.vmem [shape: bf16[64,64], index: 3, kind: input, shape index: {}]   ;;  %s1304_s10 = inlined_call_operand.vmem [shape: f32[8,256], index: 10, kind: input, shape index: {}]   ;;  %s1305_s4 = inlined_call_operand.vmem [shape: bf16[64,32], index: 4, kind: input, shape index: {}]   ;;  %s1306_s5 = inlined_call_operand.vmem [shape: bf16[32,32], index: 5, kind: input, shape index: {}]   ;;  %s1307_s1 = inlined_call_operand.vmem [shape: f32[8,16], index: 1, kind: input, shape index: {}]   ;;  %s1308_s6 = inlined_call_operand.vmem [shape: bf16[16,32], index: 6, kind: input, shape index: {}]   ;;  %s1309_s12 = inlined_call_operand.vmem [shape: f32[8,16], index: 12, kind: output, shape index: {1}]   ;;  %s1310_s7 = inlined_call_operand.vmem [shape: bf16[32,64], index: 7, kind: input, shape index: {}]   ;;  %s1311_s8 = inlined_call_operand.vmem [shape: bf16[64,64], index: 8, kind: input, shape index: {}]   ;;  %s1312_s9 = inlined_call_operand.vmem [shape: bf16[64,256], index: 9, kind: input, shape index: {}]   ;;  %s1313_s11 = inlined_call_operand.vmem [shape: f32[8,256], index: 11, kind: output, shape index: {0}]  }
   0x1   :  { %v961_v0 = vld [vmem:[%s1301_s2 + $0x40] sm:$0xff]   ;;  %v963_v2 = vld [vmem:[%s1301_s2 + $0x48] sm:$0xff]   ;;  %v965_v4 = vld [vmem:[%s1301_s2 + $0x50] sm:$0xff]   ;;  %898 = vmatprep.subr.bf16.mxu1 %v1034_v20  ;;  %906 = vmatprep.mubr.msk.bf16.mxu1 %vm1035_vm0, %v1034_v20  ;;  %vm477_vm3 = vcmask 130048  }
   0x2   :  { %v962_v1 = vld [vmem:[%s1301_s2] sm:$0xff]   ;;  %853 = vmatprep.subr.bf16.mxu0 %v961_v0  ;;  %v964_v3 = vld [vmem:[%s1301_s2 + $0x8] sm:$0xff]   ;;  %v966_v5 = vld [vmem:[%s1301_s2 + $0x10] sm:$0xff]  }
   0x3   :  { %854 = vmatpush3.bf16.msra.mxu0 %v962_v1  ;;  %v967_v6 = vld [vmem:[%s1301_s2 + $0x58] sm:$0xff]   ;;  %v969_v8 = vld [vmem:[%s1301_s2 + $0x60] sm:$0xff]   ;;  %v971_v10 = vld [vmem:[%s1301_s2 + $0x68] sm:$0xff]  }
   0x4   :  { %855 = vmatprep.subr.bf16.mxu0 %v963_v2  ;;  %v968_v7 = vld [vmem:[%s1301_s2 + $0x18] sm:$0xff]   ;;  %v970_v9 = vld [vmem:[%s1301_s2 + $0x20] sm:$0xff]   ;;  %v972_v13 = vld [vmem:[%s1301_s2 + $0x28] sm:$0xff]  }
   0x5   :  { %v41_v11 = vld [vmem:[%s1302_s0] sm:$0xff]  ;;  %v973_v14 = vld [vmem:[%s1301_s2 + $0x70] sm:$0xff]   ;;  %v975_v16 = vld [vmem:[%s1301_s2 + $0x78] sm:$0xff]  }
   0x6   :  { %v797_v12 = vcombine.high %v41_v11, %v41_v11  ;;  %v974_v15 = vld [vmem:[%s1301_s2 + $0x30] sm:$0xff]   ;;  %v976_v17 = vld [vmem:[%s1301_s2 + $0x38] sm:$0xff]   ;;  %v796_v18 = vcombine.low %v41_v11, %v41_v11  ;;  %v979_v19 = vld [vmem:[%s1303_s3] sm:$0xff]   ;;  %s1036_s2 = smov 16  }
   0x7   :  { %856 = vmatpush3.bf16.msra.mxu0 %v964_v3  ;;  %899 = vmatpush3.bf16.msra.mxu1 %v979_v19  ;;  %v980_v21 = vld [vmem:[%s1303_s3 + $0x8] sm:$0xff]   ;;  %v981_v22 = vld [vmem:[%s1303_s3 + $0x10] sm:$0xff]   ;;  %v982_v23 = vld [vmem:[%s1303_s3 + $0x18] sm:$0xff]  }
   0x8   :  { %857 = vmatprep.subr.bf16.mxu0 %v965_v4  ;;  %210 = vmatprep.mubr.bf16.mxu0 %v797_v12  ;;  %v74_v25 = vld [vmem:[%s1304_s10] ss:$0 sm:$0xff]  ;;  %v984_v37 = vld [vmem:[%s1305_s4 + $0x8] sm:$0xff]   ;;  %v985_v38 = vld [vmem:[%s1305_s4 + $0x10] sm:$0xff]  }
   0x9   :  { %900 = vmatprep.subr.bf16.mxu1 %v1034_v20  ;;  %v983_v36 = vld [vmem:[%s1305_s4] sm:$0xff]   ;;  %v986_v39 = vld [vmem:[%s1305_s4 + $0x18] sm:$0xff]   ;;  %v988_v52 = vld [vmem:[%s1306_s5 + $0x8] sm:$0xff]  }
   0xa   :  { %v233_v40 = vld [vmem:[%s1304_s10 + $0x1] ss:$0 sm:$0xff]  ;;  %v317_v54 = vld [vmem:[%s1304_s10 + $0x2] ss:$0 sm:$0xff]  ;;  %v396_v2 = vld [vmem:[%s1304_s10 + $0x3] ss:$0 sm:$0xff] }
   0xb   :  { %858 = vmatpush3.bf16.msra.mxu0 %v966_v5  ;;  %901 = vmatpush3.bf16.msra.mxu1 %v980_v21  ;;  %v987_v51 = vld [vmem:[%s1306_s5] sm:$0xff]  }
   0xc   :  { %859 = vmatprep.subr.bf16.mxu0 %v967_v6  ;;  %902 = vmatprep.subr.bf16.mxu1 %v1034_v20  ;;  %v456_v53 = vld [vmem:[%s1307_s1] sm:$0xff] }
   0xd   :  { %458 = vrot.lane.b32.xlu0 %v456_v53, %s1036_s2  ;;  %v989_v1 = vld [vmem:[%s1308_s6] sm:$0xff]  }
   0xe   :  { %v603_v53 = vld [vmem:[%s1304_s10 + $0x6] ss:$0 sm:$0xff] }
   0xf   :  { %860 = vmatpush3.bf16.msra.mxu0 %v968_v7  ;;  %903 = vmatpush3.bf16.msra.mxu1 %v981_v22 }
  0x10   :  { %861 = vmatprep.subr.bf16.mxu0 %v969_v8  ;;  %904 = vmatprep.subr.bf16.mxu1 %v1034_v20 }
  0x13   :  { %862 = vmatpush3.bf16.msra.mxu0 %v970_v9  ;;  %905 = vmatpush3.bf16.msra.mxu1 %v982_v23 }
  0x14   :  { %863 = vmatprep.subr.bf16.mxu0 %v971_v10  ;;  %910 = vmatprep.subr.bf16.mxu1 %v1034_v20 }
  0x17   :  { %864 = vmatpush3.bf16.msra.mxu0 %v972_v13 }
  0x18   :  { %865 = vmatprep.subr.bf16.mxu0 %v973_v14 }
  0x1b   :  { %866 = vmatpush3.bf16.msra.mxu0 %v974_v15 }
  0x1c   :  { %867 = vmatprep.subr.bf16.mxu0 %v975_v16  ;;  %v990_v16 = vld [vmem:[%s1310_s7] sm:$0xff]  }
  0x1f   :  { %868 = vmatpush3.bf16.msra.mxu0 %v976_v17  ;;  %v991_v17 = vld [vmem:[%s1310_s7 + $0x8] sm:$0xff]  }
  0x20   :  { %922 = vmatprep.subr.bf16.mxu0 %v1034_v20 }
  0x22   :  { %211 = vmatmul.mubr.bf16.vlgmr.msra.gmra.mrb[0].mxu0 %v796_v18  ;;  %v470_v18 = vld [vmem:[%s1304_s10 + $0x4] ss:$0 sm:$0xff] }
  0x23   :  { %926 = vmatprep.mubr.msk.bf16.mxu0 %vm1035_vm0, %v1034_v20  ;;  %923 = vmatpush3.bf16.msra.mxu0 %v987_v51  ;;  %v1005_v51 = vld [vmem:[%s1312_s9 + $0x30] ss:$8 sps:$4 sm:$0xff]  }
  0x24   :  { %924 = vmatprep.subr.bf16.mxu0 %v1034_v20 }
  0x27   :  { %925 = vmatpush3.bf16.msra.mxu0 %v988_v52  ;;  %v1038_v52 = vmov 0  }
  0x28   :  { %936 = vmatprep.subr.bf16.mxu0 %v1034_v20 }
  0x7f   :  { %v459_v10 = vpop.permute.xlu0 %458 }
  0xf5   :  { %v869_v24 = vpop.f32.mrb[0].mxu0 }
  0xf6   :  { %v870_v26 = vpop.f32.mrb[1].mxu0 }
  0xf7   :  { %v871_v27 = vadd.f32 %v870_v26, %v869_v24  ;;  %v872_v28 = vpop.f32.mrb[2].mxu0 }
  0xf8   :  { %v873_v29 = vpop.f32.mrb[3].mxu0 }
  0xf9   :  { %v213_v30 = vadd.f32 %v871_v27, %v74_v25 }
  0xfb   :  { %v814_v31 = vmul.f32 -1.442695, %v213_v30  ;;  %v992_v30 = vld [vmem:[%s1311_s8] sm:$0xff]  }
  0xfd   :  { %1008 = vpow2.f32 %v814_v31  ;;  %v993_v31 = vld [vmem:[%s1311_s8 + $0x8] sm:$0xff]  }
 0x107   :  { %v1009_v32 = vpop.eup %1008 }
 0x108   :  { %v221_v33 = vadd.f32 1.0, %v1009_v32  ;;  %v994_v32 = vld [vmem:[%s1311_s8 + $0x10] sm:$0xff]  }
 0x10a   :  { %1010 = vrcp.f32 %v221_v33  ;;  %v995_v33 = vld [vmem:[%s1311_s8 + $0x18] sm:$0xff]  }
 0x114   :  { %v1011_v34 = vpop.eup %1010 }
 0x115   :  { %v224_v35 = vpack.c.bf16 %v1011_v34, %v1011_v34  ;;  %v532_v34 = vld [vmem:[%s1304_s10 + $0x5] ss:$0 sm:$0xff] }
 0x117   :  { %907 = vmatmul.mubr.msk.bf16.vlgmr.msra.gmra.mrb[0].mxu1 %vm258_vm1, %v224_v35 }
 0x118   :  { %918 = vmatprep.mubr.msk.bf16.mxu1 %vm1035_vm0, %v1034_v20  ;;  %911 = vmatpush3.bf16.msra.mxu1 %v983_v36 }
 0x119   :  { %912 = vmatprep.subr.bf16.mxu1 %v1034_v20 }
 0x11c   :  { %913 = vmatpush3.bf16.msra.mxu1 %v984_v37 }
 0x11d   :  { %914 = vmatprep.subr.bf16.mxu1 %v1034_v20 }
 0x120   :  { %915 = vmatpush3.bf16.msra.mxu1 %v985_v38 }
 0x121   :  { %916 = vmatprep.subr.bf16.mxu1 %v1034_v20 }
 0x124   :  { %917 = vmatpush3.bf16.msra.mxu1 %v986_v39 }
 0x125   :  { %930 = vmatprep.subr.bf16.mxu1 %v1034_v20 }
 0x1ea   :  { %v296_v41 = vpop.f32.mrb[0].mxu1 }
 0x1eb   :  { %v297_v42 = vadd.f32 %v296_v41, %v233_v40  ;;  %v908_v43 = vpop.f32.mrb[1].mxu1 }
 0x1ec   :  { %v299_v44 = vpop.f32.mrb[2].mxu1 }
 0x1ed   :  { %v820_v45 = vmul.f32 -1.442695, %v297_v42  ;;  %v909_v46 = vpop.f32.mrb[3].mxu1  ;;  %v998_v44 = vld [vmem:[%s1312_s9 + $0x4] ss:$8 sps:$4 sm:$0xff]  }
 0x1ee   :  { %v1001_v46 = vld [vmem:[%s1312_s9 + $0x14] ss:$8 sps:$4 sm:$0xff]  }
 0x1ef   :  { %1012 = vpow2.f32 %v820_v45  ;;  %v996_v45 = vld [vmem:[%s1312_s9] ss:$8 sps:$4 sm:$0xff]  }
 0x1f9   :  { %v1013_v47 = vpop.eup %1012 }
 0x1fa   :  { %v305_v48 = vadd.f32 1.0, %v1013_v47  ;;  %v999_v47 = vld [vmem:[%s1312_s9 + $0x10] ss:$8 sps:$4 sm:$0xff]  }
 0x1fc   :  { %1014 = vrcp.f32 %v305_v48  ;;  %v1004_v48 = vld [vmem:[%s1312_s9 + $0x24] ss:$8 sps:$4 sm:$0xff]  }
 0x206   :  { %v1015_v49 = vpop.eup %1014 }
 0x207   :  { %v308_v50 = vpack.c.bf16 %v1015_v49, %v1015_v49  ;;  %v1002_v49 = vld [vmem:[%s1312_s9 + $0x20] ss:$8 sps:$4 sm:$0xff]  }
 0x209   :  { %919 = vmatmul.mubr.msk.bf16.vlgmr.msra.gmra.mrb[4].mxu1 %vm258_vm1, %v308_v50  ;;  %v1007_v50 = vld [vmem:[%s1312_s9 + $0x34] ss:$8 sps:$4 sm:$0xff]  }
 0x20a   :  { %932 = vmatprep.mubr.msk.bf16.mxu1 %vm1035_vm0, %v1034_v20  ;;  %931 = vmatpush3.bf16.msra.mxu1 %v989_v1 }
 0x20b   :  { %944 = vmatprep.subr.bf16.mxu1 %v1034_v20 }
 0x2dc   :  { %v379_v55 = vpop.f32.mrb[4].mxu1 }
 0x2dd   :  { %v380_v56 = vadd.f32 %v379_v55, %v317_v54  ;;  %v920_v57 = vpop.f32.mrb[5].mxu1 }
 0x2de   :  { %v382_v58 = vpop.f32.mrb[6].mxu1 }
 0x2df   :  { %v826_v59 = vmul.f32 -1.442695, %v380_v56  ;;  %v921_v60 = vpop.f32.mrb[7].mxu1 }
 0x2e1   :  { %1016 = vpow2.f32 %v826_v59 }
 0x2eb   :  { %v1017_v61 = vpop.eup %1016 }
 0x2ec   :  { %v388_v62 = vadd.f32 1.0, %v1017_v61 }
 0x2ee   :  { %1018 = vrcp.f32 %v388_v62 }
 0x2f8   :  { %v1019_v63 = vpop.eup %1018 }
 0x2f9   :  { %v391_v0 = vpack.c.bf16 %v1019_v63, %v1019_v63 }
 0x2fb   :  { %927 = vmatmul.mubr.msk.bf16.vlgmr.msra.gmra.mrb[4].mxu0 %vm409_vm2, %v391_v0  ;;  %v689_v0 = vlaneseq }
 0x2fc   :  { %940 = vmatprep.mubr.msk.bf16.mxu0 %vm1035_vm0, %v1034_v20  ;;  %937 = vmatpush3.bf16.msra.mxu0 %v990_v16 }
 0x2fd   :  { %938 = vmatprep.subr.bf16.mxu0 %v1034_v20  ;;  %v690_v1 = vshrl.u32 %v689_v0, 7 }
 0x300   :  { %939 = vmatpush3.bf16.msra.mxu0 %v991_v17 }
 0x301   :  { %742 = vmatprep.subr.bf16.mxu0 %v998_v44 }
 0x3ce   :  { %v447_v3 = vpop.f32.mrb[4].mxu0 }
 0x3cf   :  { %v448_v4 = vadd.f32 %v447_v3, %v396_v2  ;;  %v928_v5 = vpop.f32.mrb[5].mxu0  ;;  %v691_v2 = vsub.s32 0, %v690_v1  ;;  %v843_v3 = vld [vmem:[%s1304_s10 + $0x7] ss:$8 sm:$0x3] }
 0x3d0   :  { %v450_v6 = vpop.f32.mrb[6].mxu0 }
 0x3d1   :  { %v453_v7 = vmul.f32 1.442695, %v448_v4  ;;  %v929_v8 = vpop.f32.mrb[7].mxu0  ;;  %v692_v5 = vrot.slane %v843_v3, %v691_v2 }
 0x3d3   :  { %1020 = vpow2.f32 %v453_v7 }
 0x3dd   :  { %v1021_v9 = vpop.eup %1020 }
 0x3de   :  { %v455_v11 = vmul.f32 0.5, %v1021_v9 }
 0x3e0   :  { %v461_v12 = vmul.f32 %v459_v10, %v455_v11 }
 0x3e2   :  { %463 = vrot.lane.b32.xlu0 %v461_v12, %s1037_s26 }
 0x454   :  { %v464_v13 = vpop.permute.xlu0 %463 }
 0x455   :  { %v466_v14 = vadd.f32 %v464_v13, %v448_v4  ;;  %v695_v4 = vsub.s32 1, %v690_v1 }
 0x457   :  { %v467_v15 = vpack.c.bf16 %v466_v14, %v466_v14  ;;  %787 = vst.msk [vmem:[%s1309_s12] sm:$0xff] %vm477_vm3, %v466_v14  ;;  %v696_v6 = vrot.slane %v843_v3, %v695_v4 }
 0x459   :  { %933 = vmatmul.mubr.msk.bf16.vlgmr.msra.gmra.mrb[8].mxu1 %vm477_vm3, %v467_v15 }
 0x45a   :  { %952 = vmatprep.mubr.msk.bf16.mxu1 %vm1035_vm0, %v1034_v20  ;;  %945 = vmatpush3.bf16.msra.mxu1 %v992_v30 }
 0x45b   :  { %946 = vmatprep.subr.bf16.mxu1 %v1034_v20 }
 0x45e   :  { %947 = vmatpush3.bf16.msra.mxu1 %v993_v31 }
 0x45f   :  { %948 = vmatprep.subr.bf16.mxu1 %v1034_v20 }
 0x462   :  { %949 = vmatpush3.bf16.msra.mxu1 %v994_v32 }
 0x463   :  { %950 = vmatprep.subr.bf16.mxu1 %v1034_v20 }
 0x466   :  { %951 = vmatpush3.bf16.msra.mxu1 %v995_v33 }
 0x52c   :  { %v515_v19 = vpop.f32.mrb[8].mxu1 }
 0x52d   :  { %v516_v21 = vadd.f32 %v515_v19, %v470_v18  ;;  %v934_v22 = vpop.f32.mrb[9].mxu1 }
 0x52e   :  { %v518_v23 = vpop.f32.mrb[10].mxu1 }
 0x52f   :  { %v832_v24 = vmul.f32 -1.442695, %v516_v21  ;;  %v935_v25 = vpop.f32.mrb[11].mxu1 }
 0x531   :  { %1022 = vpow2.f32 %v832_v24 }
 0x53b   :  { %v1023_v26 = vpop.eup %1022 }
 0x53c   :  { %v524_v27 = vadd.f32 1.0, %v1023_v26 }
 0x53e   :  { %1024 = vrcp.f32 %v524_v27 }
 0x548   :  { %v1025_v28 = vpop.eup %1024 }
 0x549   :  { %v527_v29 = vpack.c.bf16 %v1025_v28, %v1025_v28 }
 0x54b   :  { %941 = vmatmul.mubr.msk.bf16.vlgmr.msra.gmra.mrb[8].mxu0 %vm409_vm2, %v527_v29 }
 0x54c   :  { %743 = vmatpush1.bf16.msra.mxu0 %v996_v45  ;;  %774 = vmatprep.mubr.bf16.mxu0 %v1038_v52 }
 0x54d   :  { %744 = vmatprep.subr.bf16.mxu0 %v1001_v46 }
 0x550   :  { %745 = vmatpush1.bf16.msra.mxu0 %v999_v47 }
 0x551   :  { %746 = vmatprep.subr.bf16.mxu0 %v1004_v48 }
 0x554   :  { %747 = vmatpush1.bf16.msra.mxu0 %v1002_v49 }
 0x555   :  { %748 = vmatprep.subr.bf16.mxu0 %v1007_v50 }
 0x558   :  { %749 = vmatpush1.bf16.msra.mxu0 %v1005_v51 }
 0x61e   :  { %v582_v35 = vpop.f32.mrb[8].mxu0 }
 0x61f   :  { %v583_v36 = vadd.f32 %v582_v35, %v532_v34  ;;  %v942_v37 = vpop.f32.mrb[9].mxu0 }
 0x620   :  { %v585_v38 = vpop.f32.mrb[10].mxu0 }
 0x621   :  { %v836_v39 = vmul.f32 -1.442695, %v583_v36  ;;  %v943_v40 = vpop.f32.mrb[11].mxu0 }
 0x623   :  { %1026 = vpow2.f32 %v836_v39 }
 0x62d   :  { %v1027_v41 = vpop.eup %1026 }
 0x62e   :  { %v591_v42 = vadd.f32 1.0, %v1027_v41 }
 0x630   :  { %1028 = vrcp.f32 %v591_v42 }
 0x63a   :  { %v1029_v20 = vpop.eup %1028 }
 0x63b   :  { %v594_v43 = vpack.c.bf16 %v1029_v20, %v1029_v20 }
 0x63d   :  { %953 = vmatmul.mubr.msk.bf16.vlgmr.msra.gmra.mrb[12].mxu1 %vm258_vm1, %v594_v43 }
 0x710   :  { %v665_v54 = vpop.f32.mrb[12].mxu1 }
 0x711   :  { %v666_v55 = vadd.f32 %v665_v54, %v603_v53  ;;  %v954_v56 = vpop.f32.mrb[13].mxu1 }
 0x712   :  { %v668_v57 = vpop.f32.mrb[14].mxu1 }
 0x713   :  { %v842_v58 = vmul.f32 -1.442695, %v666_v55  ;;  %v955_v59 = vpop.f32.mrb[15].mxu1 }
 0x715   :  { %1030 = vpow2.f32 %v842_v58 }
 0x71f   :  { %v1031_v60 = vpop.eup %1030 }
 0x720   :  { %v674_v61 = vadd.f32 1.0, %v1031_v60 }
 0x722   :  { %1032 = vrcp.f32 %v674_v61 }
 0x72c   :  { %v1033_v62 = vpop.eup %1032 }
 0x72d   :  { %v677_v63 = vpack.c.bf16 %v1033_v62, %v1033_v62 }
 0x72f   :  { %852 = vmatmul.mubr.msk.bf16.vlgmr.msra.gmra.mrb[12].mxu0 %vm258_vm1, %v677_v63 }
 0x802   :  { %v776_v7 = vpop.f32.mrb[12].mxu0 }
 0x803   :  { %v777_v8 = vadd.f32 %v776_v7, %v692_v5  ;;  %v778_v9 = vpop.f32.mrb[13].mxu0 }
 0x804   :  { %v779_v10 = vadd.f32 %v778_v9, %v696_v6  ;;  %v780_v11 = vpop.f32.mrb[14].mxu0 }
 0x805   :  { %v783_v12 = vmax.f32 %v777_v8, 0.0  ;;  %v781_v13 = vpop.f32.mrb[15].mxu0 }
 0x806   :  { %v784_v14 = vmax.f32 %v779_v10, 0.0 }
 0x807   :  { %785 = vst [vmem:[%s1313_s11] sm:$0xff] %v783_v12 }
 0x808   :  { %786 = vst [vmem:[%s1313_s11 + $0x8] sm:$0xff] %v784_v14 }

</bundles_post_ra>
